<compile_context>
chip_gen: v7x
topology: tpu7x:2x2x1
jax: 0.10.0
libtpu: 0.0.40
codegen_flags: <defaults>
</compile_context>

<pallas_src>
import jax
import jax.numpy as jnp
from jax import lax
from jax.experimental import pallas as pl
from jax.experimental.pallas import tpu as pltpu

_LANE = 128
_SUBLANE = 8


def _round_up(x, m):
    return ((x + m - 1) // m) * m


def _make_regloss_kernel(rows, tile_rows, tiles_per_core, need_mask):
    def kernel(pred_ref, gt_ref, loss_ref, cnt_ref):
        c = pl.program_id(0)   # core (parallel) axis
        i = pl.program_id(1)   # tile (reduction) axis

        @pl.when(i == 0)
        def _():
            loss_ref[...] = jnp.zeros_like(loss_ref)
            cnt_ref[...] = jnp.zeros_like(cnt_ref)

        pred = pred_ref[...].astype(jnp.float32)
        gt = gt_ref[...].astype(jnp.float32)

        pos = gt > 0.0
        if need_mask:
            # Logical global row of each element of this tile; rows past the
            # real array (partial last tile / clamped overrun tiles) are
            # excluded from BOTH the loss sum and the mask count.
            row_start = (c * tiles_per_core + i) * tile_rows
            row_idx = lax.broadcasted_iota(jnp.int32, (tile_rows, _LANE), 0)
            pos = jnp.logical_and(pos, (row_idx + row_start) < rows)

        d = pred - gt
        ad = jnp.abs(d)
        # SmoothL1, beta = 1.0 (PyTorch default): 0.5*d^2 if |d|<1 else |d|-0.5
        elem = jnp.where(ad < 1.0, 0.5 * d * d, ad - 0.5)
        loss_tile = jnp.where(pos, elem, 0.0)
        cnt_tile = jnp.where(pos, 1.0, 0.0)

        # View the (tile_rows, 128) tile as stacked (8,128) vregs and reduce
        # over the vreg axis: pure VPU adds, no XLU reduce inside the loop.
        loss_part = jnp.sum(loss_tile.reshape(-1, _SUBLANE, _LANE), axis=0)
        cnt_part = jnp.sum(cnt_tile.reshape(-1, _SUBLANE, _LANE), axis=0)
        loss_ref[...] += loss_part.reshape(1, _SUBLANE, _LANE)
        cnt_ref[...] += cnt_part.reshape(1, _SUBLANE, _LANE)

    return kernel


def reg_loss(pred, gt, *, tile_rows=1024, num_cores=2):
    """Equivalent of RegLoss().forward(pred, gt) for arbitrary-shaped inputs."""
    assert pred.shape == gt.shape
    n = int(pred.size)

    p = pred.reshape(-1)
    g = gt.reshape(-1)

    # Minimal lane padding: the slab must be a whole number of 128-lane rows
    # and have at least 8 rows.  gt is padded with zeros (gt <= 0), so padded
    # elements contribute neither to the loss nor the count.  When n is a
    # multiple of 128 (typical detection heads) this is a free reshape.
    padded_n = max(_round_up(n, _LANE), _SUBLANE * _LANE)
    if padded_n != n:
        p = jnp.pad(p, (0, padded_n - n))
        g = jnp.pad(g, (0, padded_n - n))
    rows = padded_n // _LANE
    p2 = p.reshape(rows, _LANE)
    g2 = g.reshape(rows, _LANE)

    # Tile sizing: multiple of 8 sublanes, never larger than the slab.
    t_rows = min(_round_up(max(int(tile_rows), _SUBLANE), _SUBLANE),
                 (rows // _SUBLANE) * _SUBLANE)
    total_tiles = pl.cdiv(rows, t_rows)
    num_cores = max(1, int(num_cores))
    tiles_per_core = pl.cdiv(total_tiles, num_cores)
    need_mask = (rows % t_rows != 0) or (total_tiles % num_cores != 0)

    def in_map(c, i):
        t = c * tiles_per_core + i
        # Clamp logical tiles past the end onto a valid tile; the in-kernel
        # row mask zeroes their contribution.
        return (jnp.minimum(t, total_tiles - 1), 0)

    kernel = _make_regloss_kernel(rows, t_rows, tiles_per_core, need_mask)

    part_loss, part_cnt = pl.pallas_call(
        kernel,
        out_shape=(
            jax.ShapeDtypeStruct((num_cores, _SUBLANE, _LANE), jnp.float32),
            jax.ShapeDtypeStruct((num_cores, _SUBLANE, _LANE), jnp.float32),
        ),
        grid_spec=pltpu.PrefetchScalarGridSpec(
            num_scalar_prefetch=0,
            grid=(num_cores, tiles_per_core),
            in_specs=[
                pl.BlockSpec((t_rows, _LANE), in_map),
                pl.BlockSpec((t_rows, _LANE), in_map),
            ],
            out_specs=[
                pl.BlockSpec((1, _SUBLANE, _LANE), lambda c, i: (c, 0, 0)),
                pl.BlockSpec((1, _SUBLANE, _LANE), lambda c, i: (c, 0, 0)),
            ],
        ),
        compiler_params=pltpu.CompilerParams(
            dimension_semantics=("parallel", "arbitrary")),
    )(p2, g2)

    # Tiny per-core partial combine + normalization in plain JAX.
    return jnp.sum(part_loss) / (jnp.sum(part_cnt) + 0.0001)


def _reg_loss_ref(pred, gt):
    """Pure-JAX reference matching the PyTorch semantics."""
    pred = pred.astype(jnp.float32)
    gt = gt.astype(jnp.float32)
    mask = (gt > 0.0).astype(jnp.float32)
    d = pred - gt
    ad = jnp.abs(d)
    elem = jnp.where(ad < 1.0, 0.5 * d * d, ad - 0.5)
    return jnp.sum(elem * mask) / (jnp.sum(mask) + 0.0001)


if __name__ == "__main__":
    key = jax.random.PRNGKey(0)

    # Small NCHW shape consistent with a detection regression head, plus
    # shapes that exercise the tail-mask / partial-tile / multi-core paths.
    shapes = [(2, 4, 16, 16), (3, 5, 7), (2, 8, 96, 128)]
    for idx, shape in enumerate(shapes):
        k1, k2 = jax.random.split(jax.random.fold_in(key, idx))
        pred = jax.random.normal(k1, shape, dtype=jnp.float32)
        gt = jax.random.uniform(k2, shape, dtype=jnp.float32,
                                minval=-1.0, maxval=1.0)
        loss = jax.block_until_ready(reg_loss(pred, gt))
        ref = jax.block_until_ready(_reg_loss_ref(pred, gt))
        assert jnp.allclose(loss, ref, rtol=1e-4, atol=1e-6), (shape, loss, ref)

    print("KERNEL_OK")
</pallas_src>

<mosaic_0001>
module attributes {stable_mosaic.version = 11 : i64} {
  func.func @kernel(%arg0: i32, %arg1: i32, %arg2: memref<16x128xf32, #tpu.memory_space<vmem>>, %arg3: memref<16x128xf32, #tpu.memory_space<vmem>>, %arg4: memref<1x8x128xf32, #tpu.memory_space<vmem>>, %arg5: memref<1x8x128xf32, #tpu.memory_space<vmem>>) attributes {dimension_semantics = [#tpu.dimension_semantics<parallel>, #tpu.dimension_semantics<arbitrary>], iteration_bounds = array<i64: 2, 1>, scalar_prefetch = 0 : i64, scratch_operands = 0 : i64, tpu.core_type = #tpu.core_type<tc>, window_params = [{transform_indices = @transform_0, window_bounds = array<i64: 16, 128>}, {transform_indices = @transform_1, window_bounds = array<i64: 16, 128>}, {transform_indices = @transform_2, window_bounds = array<i64: 1, 8, 128>}, {transform_indices = @transform_3, window_bounds = array<i64: 1, 8, 128>}]} {
    %c0_i32 = arith.constant 0 : i32
    %0 = arith.cmpi eq, %arg1, %c0_i32 : i32
    %1 = arith.extui %0 : i1 to i32
    %c0_i32_0 = arith.constant 0 : i32
    %2 = arith.cmpi ne, %1, %c0_i32_0 : i32
    scf.if %2 {
      %cst_25 = arith.constant 0.000000e+00 : f32
      %43 = vector.broadcast %cst_25 : f32 to vector<1x8x128xf32>
      %c0_26 = arith.constant 0 : index
      %c0_27 = arith.constant 0 : index
      %c0_28 = arith.constant 0 : index
      %44 = vector.load %arg4[%c0_26, %c0_27, %c0_28] : memref<1x8x128xf32, #tpu.memory_space<vmem>>, vector<1x8x128xf32>
      tpu.vector_store %arg4[%c0_26, %c0_27, %c0_28], %43 {strides = array<i32>} : memref<1x8x128xf32, #tpu.memory_space<vmem>>, vector<1x8x128xf32>,
      %cst_29 = arith.constant 0.000000e+00 : f32
      %45 = vector.broadcast %cst_29 : f32 to vector<1x8x128xf32>
      %c0_30 = arith.constant 0 : index
      %c0_31 = arith.constant 0 : index
      %c0_32 = arith.constant 0 : index
      %46 = vector.load %arg5[%c0_30, %c0_31, %c0_32] : memref<1x8x128xf32, #tpu.memory_space<vmem>>, vector<1x8x128xf32>
      tpu.vector_store %arg5[%c0_30, %c0_31, %c0_32], %45 {strides = array<i32>} : memref<1x8x128xf32, #tpu.memory_space<vmem>>, vector<1x8x128xf32>,
    } else {
    }
    %c0 = arith.constant 0 : index
    %c0_1 = arith.constant 0 : index
    %3 = vector.load %arg2[%c0, %c0_1] : memref<16x128xf32, #tpu.memory_space<vmem>>, vector<16x128xf32>
    %c0_2 = arith.constant 0 : index
    %c0_3 = arith.constant 0 : index
    %4 = vector.load %arg3[%c0_2, %c0_3] : memref<16x128xf32, #tpu.memory_space<vmem>>, vector<16x128xf32>
    %cst = arith.constant 0.000000e+00 : f32
    %5 = vector.broadcast %cst : f32 to vector<16x128xf32>
    %6 = arith.cmpf ogt, %4, %5 : vector<16x128xf32>
    %c1_i32 = arith.constant 1 : i32
    %7 = arith.muli %arg0, %c1_i32 : i32
    %8 = arith.addi %7, %arg1 : i32
    %c16_i32 = arith.constant 16 : i32
    %9 = arith.muli %8, %c16_i32 : i32
    %10 = tpu.iota {dimensions = array<i32: 0>} : vector<16x128xi32>
    %11 = vector.broadcast %9 : i32 to vector<16x128xi32>
    %12 = arith.addi %10, %11 : vector<16x128xi32>
    %c16_i32_4 = arith.constant 16 : i32
    %13 = vector.broadcast %c16_i32_4 : i32 to vector<16x128xi32>
    %14 = arith.cmpi slt, %12, %13 : vector<16x128xi32>
    %15 = arith.andi %6, %14 : vector<16x128xi1>
    %16 = arith.subf %3, %4 : vector<16x128xf32>
    %17 = math.absf %16 : vector<16x128xf32>
    %cst_5 = arith.constant 1.000000e+00 : f32
    %18 = vector.broadcast %cst_5 : f32 to vector<16x128xf32>
    %19 = arith.cmpf olt, %17, %18 : vector<16x128xf32>
    %cst_6 = arith.constant 5.000000e-01 : f32
    %20 = vector.broadcast %cst_6 : f32 to vector<16x128xf32>
    %21 = arith.mulf %20, %16 : vector<16x128xf32>
    %22 = arith.mulf %21, %16 : vector<16x128xf32>
    %cst_7 = arith.constant 5.000000e-01 : f32
    %23 = vector.broadcast %cst_7 : f32 to vector<16x128xf32>
    %24 = arith.subf %17, %23 : vector<16x128xf32>
    %25 = arith.select %19, %22, %24 : vector<16x128xi1>, vector<16x128xf32>
    %cst_8 = arith.constant 0.000000e+00 : f32
    %26 = vector.broadcast %cst_8 : f32 to vector<16x128xf32>
    %27 = arith.select %15, %25, %26 : vector<16x128xi1>, vector<16x128xf32>
    %cst_9 = arith.constant 1.000000e+00 : f32
    %cst_10 = arith.constant 0.000000e+00 : f32
    %28 = vector.broadcast %cst_9 : f32 to vector<16x128xf32>
    %29 = vector.broadcast %cst_10 : f32 to vector<16x128xf32>
    %30 = arith.select %15, %28, %29 : vector<16x128xi1>, vector<16x128xf32>
    %31 = vector.shape_cast %27 : vector<16x128xf32> to vector<2x8x128xf32>
    %cst_11 = arith.constant dense<0.000000e+00> : vector<8x128xf32>
    %32 = vector.multi_reduction <add>, %31, %cst_11 [0] : vector<2x8x128xf32> to vector<8x128xf32>
    %33 = vector.shape_cast %30 : vector<16x128xf32> to vector<2x8x128xf32>
    %cst_12 = arith.constant dense<0.000000e+00> : vector<8x128xf32>
    %34 = vector.multi_reduction <add>, %33, %cst_12 [0] : vector<2x8x128xf32> to vector<8x128xf32>
    %c0_13 = arith.constant 0 : index
    %c0_14 = arith.constant 0 : index
    %c0_15 = arith.constant 0 : index
    %35 = vector.load %arg4[%c0_13, %c0_14, %c0_15] : memref<1x8x128xf32, #tpu.memory_space<vmem>>, vector<1x8x128xf32>
    %36 = vector.shape_cast %32 : vector<8x128xf32> to vector<1x8x128xf32>
    %37 = arith.addf %35, %36 : vector<1x8x128xf32>
    %c0_16 = arith.constant 0 : index
    %c0_17 = arith.constant 0 : index
    %c0_18 = arith.constant 0 : index
    %38 = vector.load %arg4[%c0_16, %c0_17, %c0_18] : memref<1x8x128xf32, #tpu.memory_space<vmem>>, vector<1x8x128xf32>
    tpu.vector_store %arg4[%c0_16, %c0_17, %c0_18], %37 {strides = array<i32>} : memref<1x8x128xf32, #tpu.memory_space<vmem>>, vector<1x8x128xf32>,
    %c0_19 = arith.constant 0 : index
    %c0_20 = arith.constant 0 : index
    %c0_21 = arith.constant 0 : index
    %39 = vector.load %arg5[%c0_19, %c0_20, %c0_21] : memref<1x8x128xf32, #tpu.memory_space<vmem>>, vector<1x8x128xf32>
    %40 = vector.shape_cast %34 : vector<8x128xf32> to vector<1x8x128xf32>
    %41 = arith.addf %39, %40 : vector<1x8x128xf32>
    %c0_22 = arith.constant 0 : index
    %c0_23 = arith.constant 0 : index
    %c0_24 = arith.constant 0 : index
    %42 = vector.load %arg5[%c0_22, %c0_23, %c0_24] : memref<1x8x128xf32, #tpu.memory_space<vmem>>, vector<1x8x128xf32>
    tpu.vector_store %arg5[%c0_22, %c0_23, %c0_24], %41 {strides = array<i32>} : memref<1x8x128xf32, #tpu.memory_space<vmem>>, vector<1x8x128xf32>,
    return
  }
  func.func @transform_0(%arg0: i32, %arg1: i32) -> (i32, i32) {
    %c1_i32 = arith.constant 1 : i32
    %0 = arith.muli %arg0, %c1_i32 : i32
    %1 = arith.addi %0, %arg1 : i32
    %c0_i32 = arith.constant 0 : i32
    %2 = arith.minsi %1, %c0_i32 : i32
    %c0_i32_0 = arith.constant 0 : i32
    %c0_i32_1 = arith.constant 0 : i32
    return %2, %c0_i32_0 : i32, i32
  }
  func.func @transform_1(%arg0: i32, %arg1: i32) -> (i32, i32) {
    %c1_i32 = arith.constant 1 : i32
    %0 = arith.muli %arg0, %c1_i32 : i32
    %1 = arith.addi %0, %arg1 : i32
    %c0_i32 = arith.constant 0 : i32
    %2 = arith.minsi %1, %c0_i32 : i32
    %c0_i32_0 = arith.constant 0 : i32
    %c0_i32_1 = arith.constant 0 : i32
    return %2, %c0_i32_0 : i32, i32
  }
  func.func @transform_2(%arg0: i32, %arg1: i32) -> (i32, i32, i32) {
    %c0_i32 = arith.constant 0 : i32
    %c0_i32_0 = arith.constant 0 : i32
    %c0_i32_1 = arith.constant 0 : i32
    return %arg0, %c0_i32, %c0_i32_0 : i32, i32, i32
  }
  func.func @transform_3(%arg0: i32, %arg1: i32) -> (i32, i32, i32) {
    %c0_i32 = arith.constant 0 : i32
    %c0_i32_0 = arith.constant 0 : i32
    %c0_i32_1 = arith.constant 0 : i32
    return %arg0, %c0_i32, %c0_i32_0 : i32, i32, i32
  }
}

</mosaic_0001>

<bundles_post_ra>
// kernel: tpu_custom_call.1
= control target key start
LH: loop header
LB: loop body
LE: loop exit
PB: predicated region body
PF: predicated region fallthrough
CT: control target
= control target key end

     0   :  { %9 = vsyncpa [#allocation3], 0  ;;  %s1113_s0 = inlined_call_operand.hbm [shape: f32[16,128], index: 0, kind: input, shape index: {}]   ;;  %s1114_s1 = inlined_call_operand.hbm [shape: f32[16,128], index: 1, kind: input, shape index: {}]   ;;  %s1115_s2 = inlined_call_operand.hbm [shape: f32[2,8,128], index: 2, kind: output, shape index: {0}]   ;;  %s1116_s3 = inlined_call_operand.hbm [shape: f32[2,8,128], index: 3, kind: output, shape index: {1}]  }
   0x1   :  { %11 = vsyncpa [#allocation3 + $0x1], 0 }
   0x2   :  { %12 = vsyncpa [#allocation6], 0 }
   0x3   :  { %14 = vsyncpa [#allocation6 + $0x1], 0 }
   0x4   :  { %15 = vsyncpa [#allocation4], 0 }
   0x5   :  { %17 = vsyncpa [#allocation4 + $0x1], 0 }
   0x6   :  { %18 = vsyncpa [#allocation9], 0 }
   0x7   :  { %20 = vsyncpa [#allocation9 + $0x1], 0  ;;  %s846_s12 = smov 0   ;;  %s848_s13 = smov 0  }
   0x8   :  { %s850_s14 = smov 0   ;;  %s852_s15 = smov 0  }
   0x9   :  { %s854_s16 = smov 0   ;;  %s856_s17 = smov 0  }
   0xa   :  { %s858_s18 = smov 0   ;;  %s860_s19 = smov 0  }
   0xb LB: > { %s493_s20 = sadd.s32 4294967295, %s817_s19   ;;  %s494_s21 = sadd.s32 4294967294, %s817_s19   ;;  %s817_s19 = sphi %s860_s19, %s26_s19   ;;  %s813_s18 = sphi %s858_s18, %s1139_s18   ;;  %s809_s17 = sphi %s856_s17, %s1138_s17   ;;  %s805_s16 = sphi %s854_s16, %s1103_s16   ;;  %s801_s15 = sphi %s852_s15, %s1137_s15   ;;  %s797_s14 = sphi %s850_s14, %s1136_s14   ;;  %s793_s13 = sphi %s848_s13, %s1135_s13   ;;  %s789_s12 = sphi %s846_s12, %s1134_s12  }
   0xc   : > { %s38_s22 = sadd.s32 1, %s813_s18  ;;  %p786_p1 = scmp.ne.s32.totalorder %s805_s16, 0 }
   0xd   : > { %p40_p0 = scmp.ge.s32.totalorder %s38_s22, 2  ;;  %p59_p2 = scmp.eq.s32.totalorder %s817_s19, 0 }
   0xe   : > { %p64_p3 = scmp.ne.s32.totalorder %s805_s16, %s801_s15  ;;  %p65_p5 = scmp.eq.s32.totalorder %s493_s20, 0 }
   0xf   : > { %s1141_s22 = smov (%p40_p0, %s38_s22), 0  ;;  %p892_p4 = por %p786_p1, %p59_p2 }
  0x10   : > { %p896_p6 = por %p65_p5, %p64_p3  ;;  %s106_s25 = ssub.s32 %s813_s18, %s1141_s22 }
  0x11   : > { %p107_p7 = scmp.eq.s32.totalorder %s106_s25, 0  ;;  %s109_s26 = sadd.s32 1, %s797_s14 }
  0x12   : > { %s1120_s24 = scalar_select %p896_p6, 1, 0 }
  0x13   : > { %s904_s27 = scalar_select %p107_p7, %s797_s14, %s109_s26  }
  0x14   : > { %p119_p8 = scmp.ne.s32.totalorder %s797_s14, %s793_s13  ;;  %p120_p9 = scmp.eq.s32.totalorder %s493_s20, 1 }
  0x15   : > { %p125_p10 = scmp.ne.s32.totalorder %s793_s13, %s789_s12  ;;  %p126_p11 = scmp.eq.s32.totalorder %s494_s21, 1 }
  0x16   : > { %p910_p12 = por %p120_p9, %p119_p8  ;;  %p541_p1 = scmp.lt.s32.totalorder %s817_s19, 2 }
  0x17   : > { %p915_p0 = por %p126_p11, %p125_p10  ;;  %s819_s30 = smov [#allocation2]  }
  0x18   : > { %s1121_s28 = scalar_select %p910_p12, 1, 0 }
  0x19   : > { %s1122_s29 = scalar_select %p915_p0, 1, 0 }
  0x1a   : > { %s186_s4 = sshll.u32 %s819_s30, 4  ;;  %p922_p2 = pnand %p541_p1, %p892_p4  ;;  %s187_s4 = int_to_ptr.vmem [resolvable:$true] %s186_s4 }
  0x1b   : > { %s618_s8 = scalar_lea.hbm %s1113_s0, 256 }
  0x1c   : > { %p619_p3 = scmp.ne.s32.totalorder %s1113_s0, %s618_s8  ;;  %p620_p5 = pneg %p922_p2 }
  0x1d   : > { %p625_p8 = scmp.lt.u32.totalorder %s618_s8, %s618_s8  ;;  %p627_p9 = scmp.lt.u32.totalorder %s618_s8, %s1113_s0 }
  0x1e   : > { %p621_p7 = pnand %p620_p5, %p619_p3 }
  0x1f   : > { %p628_p10 = por %p627_p9, %p625_p8 }
  0x20   : > { %p622_p4 = pneg %p621_p7 }
  0x22   : > { %p629_p11 = pnand %p628_p10, %p622_p4 }
  0x24   : > { %632 = shalt.err (!%p629_p11)
}
  0x25   : > { %s633_s20 = scalar_lea.vmem %s187_s4, 256  ;;  %s640_s21 = scalar_lea.vmem %s187_s4, 512 }
  0x26   : > { %p634_p1 = scmp.ne.s32.totalorder %s187_s4, %s633_s20  ;;  %p641_p12 = scmp.lt.s32.totalorder %s187_s4, %s187_s4 }
  0x27   : > { %p642_p6 = scmp.lt.s32.totalorder %s640_s21, %s633_s20 }
  0x28   : > { %p636_p13 = pnand %p634_p1, %p620_p5 }
  0x29   : > { %p643_p3 = por %p642_p6, %p641_p12 }
  0x2a   : > { %p637_p0 = pneg %p636_p13 }
  0x2c   : > { %p644_p7 = pnand %p643_p3, %p637_p0 }
  0x2e   : > { %647 = shalt.err (!%p644_p7)
}
  0x2f   : > { %s820_s23 = smov 128   ;;  %s821_s25 = smov 8  }
  0x30   : > { %530 = dma.hbm_to_vmem [thread:$0]  (!%p922_p2), %s1113_s0, 256, %s187_s4, [#allocation3], %s820_s23, %s820_s23, %s821_s25  }
  0x31   : > { %p503_p13 = scmp.ge.s32.totalorder %s817_s19, 1  ;;  %p218_p4 = scmp.lt.s32.totalorder %s817_s19, 3 }
  0x32   : > { %s822_s7 = smov [#allocation5]   ;;  %s648_s11 = scalar_lea.hbm %s1114_s1, 256 }
  0x33   : > { %p953_p8 = pnand %p503_p13, %p218_p4  ;;  %s210_s8 = sshll.u32 %s822_s7, 4  ;;  %s211_s8 = int_to_ptr.vmem [resolvable:$true] %s210_s8 }
  0x34   : > { %p649_p6 = scmp.ne.s32.totalorder %s1114_s1, %s648_s11  ;;  %p655_p9 = scmp.lt.u32.totalorder %s648_s11, %s648_s11 }
  0x35   : > { %s1124_s6 = scalar_select %p953_p8, 1, 0 }
  0x36   : > { %p651_p12 = pnand %p649_p6, %p620_p5  ;;  %p657_p10 = scmp.lt.u32.totalorder %s648_s11, %s1114_s1 }
  0x38   : > { %p652_p0 = pneg %p651_p12  ;;  %p658_p11 = por %p657_p10, %p655_p9 }
  0x3a   : > { %p659_p1 = pnand %p658_p11, %p652_p0 }
  0x3c   : > { %662 = shalt.err (!%p659_p1)
}
  0x3d   : > { %s663_s26 = scalar_lea.vmem %s211_s8, 256  ;;  %s670_s30 = scalar_lea.vmem %s211_s8, 512 }
  0x3e   : > { %p664_p3 = scmp.ne.s32.totalorder %s211_s8, %s663_s26  ;;  %p671_p4 = scmp.lt.s32.totalorder %s211_s8, %s211_s8 }
  0x3f   : > { %p672_p8 = scmp.lt.s32.totalorder %s670_s30, %s663_s26 }
  0x40   : > { %p666_p7 = pnand %p664_p3, %p620_p5 }
  0x41   : > { %p673_p6 = por %p672_p8, %p671_p4 }
  0x42   : > { %p667_p13 = pneg %p666_p7 }
  0x44   : > { %p674_p12 = pnand %p673_p6, %p667_p13 }
  0x46   : > { %677 = shalt.err (!%p674_p12)
}
  0x47   : > { %533 = dma.hbm_to_vmem [thread:$0]  (!%p922_p2), %s1114_s1, 256, %s211_s8, [#allocation6], %s820_s23, %s820_s23, %s821_s25  }
  0x48   : > { %p1125_p0 = scmp.ne.s32.totalorder %s1124_s6, 0 }
  0x49   : > { %s224_s10 = sand.u32 (!%p1125_p0), 1, %s805_s16   ;;  %p1126_p5 = scmp.ne.s32.totalorder (!%p1125_p0), %s1120_s24, 0 }
  0x4a   : > { %222 = sbr.rel (%p1125_p0) target bundleno = 135 (0x87), region = 28  ;;  %s504_s11 = sshll.u32 (!%p1125_p0), %s224_s10, 4 }
  0x4b   : > { %s225_s15 = scalar_lea.sflag (!%p1125_p0), [#allocation3], %s224_s10  ;;  %s228_s20 = scalar_lea.vmem (!%p1125_p0), [#allocation2], %s504_s11 }
  0x51   : > { %771 = dma.done.wait (%p1126_p5), %s225_s15, 256  }
  0x52   : > { %773 = vsyncadd (%p1126_p5), %s225_s15, 4294967040  ;;  %s234_s5 = scalar_lea.sflag [#allocation6], %s224_s10  ;;  %s237_s4 = scalar_lea.vmem [#allocation5], %s504_s11 }
  0x53   : > { %775 = dma.done.wait (%p1126_p5), %s234_s5, 256  }
  0x54   : > { %777 = vsyncadd (%p1126_p5), %s234_s5, 4294967040  ;;  %s508_s23 = sshll.u32 %s809_s17, 4  ;;  %v292_v0 = vlaneseq  ;;  %s993_s25 = sand.u32 1, %s793_s13   ;;  %v284_v6 = vld [vmem:[%s228_s20] sm:$0xff]  ;;  %v285_v7 = vld [vmem:[%s228_s20 + $0x8] sm:$0xff]  ;;  %v823_v16 = vmov 0.0  }
  0x55   : > { %v295_v1 = vstv %s508_s23  ;;  %s506_s6 = sshll.u32 %s993_s25, 3  ;;  %v286_v8 = vld [vmem:[%s237_s4] sm:$0xff]  ;;  %v287_v9 = vld [vmem:[%s237_s4 + $0x8] sm:$0xff]  ;;  %s513_s24 = sshll.u32 %s809_s17, 7 }
  0x56   : > { %v293_v2 = vshrl.u32 %v292_v0, 7  ;;  %vm288_vm1 = vcmp.gt.f32.partialorder %v286_v8, 0.0  ;;  %v302_v10 = vsub.f32 %v284_v6, %v286_v8  ;;  %vm289_vm3 = vcmp.gt.f32.partialorder %v287_v9, 0.0  ;;  %s269_s8 = scalar_lea.vmem [#allocation8], %s506_s6  ;;  %s1016_s7 = scalar_lea.hbm %s1116_s3, %s513_s24 }
  0x57   : > { %v303_v12 = vsub.f32 %v285_v7, %v287_v9  ;;  %s360_s21 = sshll.u32 %s269_s8, 4  ;;  %s1026_s9 = scalar_lea.vmem [#allocation7], %s506_s6  ;;  %s1018_s21 = int_to_ptr.vmem [resolvable:$true] %s360_s21 }
  0x58   : > { %v294_v3 = vadd.s32 8, %v293_v2  ;;  %v296_v4 = vadd.s32 %v295_v1, %v293_v2  ;;  %v304_v14 = vand.u32 2147483647, %v302_v10  ;;  %v308_v15 = vmul.f32 0.5, %v302_v10  ;;  %s347_s10 = sshll.u32 %s1026_s9, 4  ;;  %s334_s11 = scalar_lea.sflag [#allocation9], %s993_s25  ;;  %s1060_s10 = int_to_ptr.vmem [resolvable:$true] %s347_s10 }
  0x59   : > { %v305_v18 = vand.u32 2147483647, %v303_v12  ;;  %v309_v19 = vmul.f32 0.5, %v303_v12  ;;  %s678_s15 = scalar_lea.vmem %s1018_s21, 128  ;;  %p1131_p8 = scmp.ne.s32.totalorder %s1121_s28, 0 }
  0x5a   : > { %v297_v5 = vadd.s32 %v295_v1, %v294_v3  ;;  %vm298_vm0 = vcmp.lt.s32.totalorder %v296_v4, 16  ;;  %vm306_vm6 = vcmp.lt.f32.partialorder %v304_v14, 1.0  ;;  %v310_v21 = vmul.f32 %v308_v15, %v302_v10  ;;  %p679_p2 = scmp.ne.s32.totalorder %s1018_s21, %s678_s15  ;;  %s824_s20 = smov [#allocation8]  }
  0x5b   : > { %vm996_vm4 = vmand %vm288_vm1, %vm298_vm0  ;;  %v509_v22 = vadd.f32 -0.5, %v304_v14  ;;  %vm307_vm7 = vcmp.lt.f32.partialorder %v305_v18, 1.0  ;;  %v311_v24 = vmul.f32 %v309_v19, %v303_v12  ;;  %v510_v25 = vadd.f32 -0.5, %v305_v18  ;;  %s682_s5 = sshll.u32 %s824_s20, 4  ;;  %s683_s5 = int_to_ptr.vmem [resolvable:$false] %s682_s5 }
  0x5c   : > { %vm299_vm2 = vcmp.lt.s32.totalorder %v297_v5, 16  ;;  %v318_v17 = vsel %vm996_vm4, 1.0, %v823_v16  ;;  %p680_p9 = pnand %p679_p2, %p1131_p8  ;;  %s684_s4 = scalar_lea.vmem %s683_s5, 256 }
  0x5d   : > { %vm1000_vm5 = vmand %vm289_vm3, %vm299_vm2  ;;  %v314_v26 = vsel %vm306_vm6, %v310_v21, %v509_v22  ;;  %v315_v27 = vsel %vm307_vm7, %v311_v24, %v510_v25  ;;  %p685_p11 = scmp.lt.s32.totalorder %s1018_s21, %s683_s5  ;;  %p686_p1 = scmp.lt.s32.totalorder %s684_s4, %s678_s15 }
  0x5e   : > { %v319_v20 = vsel %vm1000_vm5, 1.0, %v823_v16  ;;  %v316_v28 = vsel %vm996_vm4, %v314_v26, 0.0  ;;  %v317_v29 = vsel %vm1000_vm5, %v315_v27, 0.0  ;;  %p681_p10 = pneg %p680_p9 }
  0x5f   : > { %v321_v23 = vadd.f32 %v319_v20, %v318_v17  ;;  %v320_v30 = vadd.f32 %v317_v29, %v316_v28  ;;  %p687_p3 = por %p686_p1, %p685_p11 }
  0x61   : > { %327 = vst [vmem:[%s269_s8] sm:$0xff] %v321_v23  ;;  %p688_p7 = pnand %p687_p3, %p681_p10 }
  0x63   : > { %691 = shalt.err (!%p688_p7)
}
  0x64   : > { %s692_s23 = scalar_lea.hbm %s1016_s7, 128  ;;  %s696_s26 = scalar_lea.hbm %s1116_s3, 256 }
  0x65   : > { %p693_p13 = scmp.ne.s32.totalorder %s1016_s7, %s692_s23  ;;  %p697_p12 = scmp.lt.u32.totalorder %s1016_s7, %s1116_s3 }
  0x66   : > { %p698_p0 = scmp.lt.u32.totalorder %s696_s26, %s692_s23  ;;  %p700_p2 = scmp.lt.u32.totalorder %s692_s23, %s1016_s7 }
  0x67   : > { %p694_p4 = pnand %p693_p13, %p1131_p8 }
  0x68   : > { %p699_p5 = por %p698_p0, %p697_p12 }
  0x69   : > { %p695_p6 = pneg %p694_p4 }
  0x6a   : > { %p701_p9 = por %p700_p2, %p699_p5 }
  0x6c   : > { %p702_p10 = pnand %p701_p9, %p695_p6 }
  0x6e   : > { %705 = shalt.err (!%p702_p10)
}
  0x6f   : > { %524 = dma.vmem_to_hbm [thread:$0]  (%p1131_p8), %s1018_s21, 128, %s1016_s7, %s334_s11   ;;  %324 = vst [vmem:[%s1026_s9] sm:$0xff] %v320_v30 }
  0x70   : > { %s1056_s4 = scalar_lea.hbm %s1115_s2, %s513_s24  ;;  %s329_s23 = scalar_lea.sflag [#allocation4], %s993_s25 }
  0x71   : > { %s706_s6 = scalar_lea.vmem %s1060_s10, 128  ;;  %s825_s21 = smov [#allocation7]  }
  0x72   : > { %p707_p11 = scmp.ne.s32.totalorder %s1060_s10, %s706_s6  ;;  %s710_s17 = sshll.u32 %s825_s21, 4  ;;  %s711_s17 = int_to_ptr.vmem [resolvable:$false] %s710_s17 }
  0x73   : > { %s712_s7 = scalar_lea.vmem %s711_s17, 256  ;;  %p713_p7 = scmp.lt.s32.totalorder %s1060_s10, %s711_s17 }
  0x74   : > { %p708_p1 = pnand %p707_p11, %p1131_p8  ;;  %p714_p13 = scmp.lt.s32.totalorder %s712_s7, %s706_s6 }
  0x76   : > { %p709_p3 = pneg %p708_p1  ;;  %p715_p4 = por %p714_p13, %p713_p7 }
  0x78   : > { %p716_p6 = pnand %p715_p4, %p709_p3 }
  0x7a   : > { %719 = shalt.err (!%p716_p6)
}
  0x7b   : > { %s720_s25 = scalar_lea.hbm %s1056_s4, 128  ;;  %s724_s11 = scalar_lea.hbm %s1115_s2, 256 }
  0x7c   : > { %p721_p12 = scmp.ne.s32.totalorder %s1056_s4, %s720_s25  ;;  %p725_p2 = scmp.lt.u32.totalorder %s1056_s4, %s1115_s2 }
  0x7d   : > { %p726_p9 = scmp.lt.u32.totalorder %s724_s11, %s720_s25  ;;  %p728_p11 = scmp.lt.u32.totalorder %s720_s25, %s1056_s4 }
  0x7e   : > { %p722_p0 = pnand %p721_p12, %p1131_p8 }
  0x7f   : > { %p727_p10 = por %p726_p9, %p725_p2 }
  0x80   : > { %p723_p5 = pneg %p722_p0 }
  0x81   : > { %p729_p1 = por %p728_p11, %p727_p10 }
  0x83   : > { %p730_p3 = pnand %p729_p1, %p723_p5 }
  0x85   : > { %733 = shalt.err (!%p730_p3)
}
  0x86   : > { %523 = dma.vmem_to_hbm [thread:$0]  (%p1131_p8), %s1060_s10, 128, %s1056_s4, %s329_s23  }
  0x87 PF: > { %s372_s30 = sand.u32 1, %s789_s12   ;;  %p1132_p7 = scmp.ne.s32.totalorder %s1122_s29, 0 }
  0x88   : > { %p1133_p13 = scmp.ge.s32.totalorder %s817_s19, 2  ;;  %s373_s20 = scalar_lea.sflag [#allocation4], %s372_s30 }
  0x8a   : > { %p535_p4 = pnand %p1133_p13, %p1132_p7 }
  0x8c   : > { %779 = dma.done.wait (!%p535_p4), %s373_s20, 128  }
  0x8d   : > { %781 = vsyncadd (!%p535_p4), %s373_s20, 4294967168  ;;  %s382_s15 = scalar_lea.sflag [#allocation9], %s372_s30 }
  0x8e   : > { %783 = dma.done.wait (!%p535_p4), %s382_s15, 128  }
  0x8f   : > { %785 = vsyncadd (!%p535_p4), %s382_s15, 4294967168  ;;  %s26_s19 = sadd.s32 1, %s817_s19   ;;  %s1134_s12 = smov %s793_s13 }
  0x90   : > { %p23_p6 = scmp.ge.s32.totalorder %s26_s19, 4   ;;  %s1135_s13 = smov %s797_s14 }
  0x91   : > { %s1136_s14 = smov %s904_s27  ;;  %s1137_s15 = smov %s805_s16 }
  0x92   : > { %s1103_s16 = smov 0   ;;  %s1138_s17 = smov %s813_s18 }
  0x93   : > { %s1139_s18 = smov %s1141_s22  ;;  %25 = sbr.rel (!%p23_p6) target bundleno = 11 (0xb), region = 107 }
  0x9a   :  { %387 = vsyncpa [#allocation3], 1 }
  0x9b   :  { %389 = vsyncpa [#allocation3 + $0x1], 1 }
  0x9c   :  { %390 = vsyncpa [#allocation6], 1 }
  0x9d   :  { %392 = vsyncpa [#allocation6 + $0x1], 1 }
  0x9e   :  { %393 = vsyncpa [#allocation4], 1 }
  0x9f   :  { %395 = vsyncpa [#allocation4 + $0x1], 1 }
  0xa0   :  { %396 = vsyncpa [#allocation9], 1 }
  0xa1   :  { %398 = vsyncpa [#allocation9 + $0x1], 1 }

</bundles_post_ra>
